<compile_context>
chip_gen: v5e
topology: v5e:2x2
jax: 0.10.0
libtpu: 0.0.40
codegen_flags: <defaults>
</compile_context>

<pallas_src>
import functools

import jax
import jax.numpy as jnp
import numpy as np
from jax import lax
from jax.experimental import pallas as pl
from jax.experimental.pallas import tpu as pltpu

# lowbias32 hash constants (Chris Wellons) + golden-ratio seed mixer.
_GOLDEN_I32 = int(np.uint32(0x9E3779B9).view(np.int32))   # -1640531527
_HASH_C1 = 0x7FEB352D
_HASH_C2 = 0x846CA68B


def _dropout_kernel(seed_ref, x_ref, o_ref, *, threshold_u32):
    rt, lanes = x_ref.shape

    # Global element index for every element of this block (hash counter).
    row0 = pl.program_id(0) * rt
    r = lax.broadcasted_iota(jnp.int32, (rt, lanes), 0)
    c = lax.broadcasted_iota(jnp.int32, (rt, lanes), 1)
    idx = (row0 + r) * lanes + c

    # Counter-based PRNG: lowbias32(idx + seed * golden).  Pure elementwise
    # integer ops -- no pltpu.prng_seed, deterministic per (seed, element).
    seed_mix = seed_ref[0] * jnp.int32(_GOLDEN_I32)
    v = (idx + seed_mix).astype(jnp.uint32)
    v = v ^ (v >> 16)
    v = v * jnp.uint32(_HASH_C1)
    v = v ^ (v >> 15)
    v = v * jnp.uint32(_HASH_C2)
    v = v ^ (v >> 16)

    # Single unsigned integer threshold compare: drop iff u32 < rate * 2^32.
    # TODO(synk): for bf16/int8 inputs, draw lanes/2 (or lanes/4) u32 hashes and
    # threshold 16/8-bit sub-fields to halve/quarter the per-element PRNG work.
    keep = v >= jnp.uint32(threshold_u32)

    x = x_ref[...]
    o_ref[...] = jnp.where(keep, x, jnp.zeros_like(x))


def _round_up(a, b):
    return -(-a // b) * b


def dropout_pallas(
    x,
    rate=0.3,
    seed=0,
    *,
    row_tile=None,
    target_block_bytes=4 * 1024 * 1024,
    vmem_limit_bytes=None,
):
    """Element-wise dropout matching the reference numpy forward (no rescale).

    Works on any input shape: the array is viewed as a lane-dense
    [rows, lanes] slab, the row axis is tiled across the grid, and the result
    is reshaped back to the original shape.
    """
    orig_shape = x.shape
    dtype = x.dtype
    total = int(np.prod(orig_shape)) if orig_shape else 1
    itemsize = jnp.dtype(dtype).itemsize

    # Lane-dense last dim (multiple of 128) -> unmasked full-vreg stores.
    lanes = 512 if total >= 8 * 512 else 128
    # Sublane multiple per dtype packing: f32 -> 8, bf16 -> 16, int8/fp8 -> 32.
    sub = max(8, 32 // itemsize)
    rows = pl.cdiv(total, lanes)

    # Row tile: ~target_block_bytes per block (2-8 MiB sweet spot), sublane aligned.
    bytes_per_row = lanes * itemsize
    if row_tile is None:
        rt = max(sub, (target_block_bytes // bytes_per_row) // sub * sub)
    else:
        rt = max(sub, (int(row_tile) // sub) * sub)
    # v7x has 2 TensorCores: for medium inputs keep >= 2 grid blocks so
    # dimension_semantics=("parallel",) can shard rows across both cores.
    if rows > 2 * sub:
        rt = min(rt, _round_up(pl.cdiv(rows, 2), sub))
    if rt >= rows:
        rt = rows  # single block == full array dims (allowed by the (8,128) rule)

    grid = (pl.cdiv(rows, rt),)

    # Pad only up to a multiple of `lanes` (< one row of extra traffic); the
    # common NN-activation case total % lanes == 0 skips pad + trailing slice
    # entirely.  Partial last row-BLOCKS are handled by Pallas masked writeback.
    padded_total = rows * lanes
    flat = x.reshape(-1)
    if padded_total != total:
        flat = jnp.pad(flat, (0, padded_total - total))
    x2d = flat.reshape(rows, lanes)

    # Drop iff u32 < rate * 2^32 (clamped to uint32 range).
    threshold_u32 = min(max(int(round(float(rate) * (1 << 32))), 0), (1 << 32) - 1)

    # 2-in + 2-out double buffers plus small integer intermediates, with
    # headroom but well under v7x's 64 MiB per-core VMEM.
    if vmem_limit_bytes is None:
        block_bytes = rt * lanes * itemsize
        vmem_limit_bytes = int(
            min(32 * 1024 * 1024, max(16 * 1024 * 1024, 6 * block_bytes + (2 << 20)))
        )

    seed_arr = jnp.asarray([seed], dtype=jnp.int32)

    out2d = pl.pallas_call(
        functools.partial(_dropout_kernel, threshold_u32=threshold_u32),
        out_shape=jax.ShapeDtypeStruct((rows, lanes), dtype),
        grid_spec=pltpu.PrefetchScalarGridSpec(
            num_scalar_prefetch=1,  # seed lives in SMEM, passed to index_maps
            grid=grid,
            in_specs=[pl.BlockSpec((rt, lanes), lambda i, seed: (i, 0))],
            out_specs=pl.BlockSpec((rt, lanes), lambda i, seed: (i, 0)),
        ),
        compiler_params=pltpu.CompilerParams(
            dimension_semantics=("parallel",),
            vmem_limit_bytes=vmem_limit_bytes,
        ),
    )(seed_arr, x2d)

    if padded_total != total:
        return out2d.reshape(-1)[:total].reshape(orig_shape)
    return out2d.reshape(orig_shape)


class DropoutPallas:
    """Mirror of the reference `Dropout` module (forward pass, no 1/(1-p) rescale)."""

    def __init__(self, rate=0.3):
        self.rate = rate
        self.info = f"Module:\n**   Dropout({rate})"

    def forward(self, x, seed=0):
        # Reference forward zeroes with probability `rate` and does NOT rescale
        # kept activations; we match that exactly.
        # TODO(synk): backward() needs the drop mask; it is exactly recomputable
        # from the same (seed, element-index) hash, or could be emitted as a
        # second kernel output -- not materialized here.
        return dropout_pallas(x, rate=self.rate, seed=seed)

    def __repr__(self):
        return self.info


if __name__ == "__main__":
    key = jax.random.PRNGKey(0)
    x = jax.random.normal(key, (2, 4, 16, 16), dtype=jnp.float32)

    mod = DropoutPallas(rate=0.3)
    out = jax.block_until_ready(mod.forward(x, seed=1234))

    x_np = np.asarray(x)
    out_np = np.asarray(out)

    assert out_np.shape == x_np.shape
    # Every element is either passed through untouched or exactly zeroed.
    assert np.all((out_np == 0.0) | (out_np == x_np)), "non-dropout modification"
    # Empirical drop fraction near `rate` (loose bound; deterministic per seed).
    dropped = float(np.mean(out_np == 0.0))
    assert 0.15 < dropped < 0.45, f"drop fraction {dropped} far from 0.3"
    # Deterministic for a fixed seed.
    out2 = jax.block_until_ready(mod.forward(x, seed=1234))
    assert np.array_equal(out_np, np.asarray(out2)), "non-deterministic output"

    print("KERNEL_OK")
</pallas_src>

<mosaic_0001>
module attributes {stable_mosaic.version = 11 : i64} {
  func.func @_dropout_kernel(%arg0: i32, %arg1: memref<1xi32, #tpu.memory_space<smem>>, %arg2: memref<16x128xf32, #tpu.memory_space<vmem>>, %arg3: memref<16x128xf32, #tpu.memory_space<vmem>>) attributes {dimension_semantics = [#tpu.dimension_semantics<parallel>], iteration_bounds = array<i64: 1>, scalar_prefetch = 1 : i64, scratch_operands = 0 : i64, tpu.core_type = #tpu.core_type<tc>, window_params = [{transform_indices = @transform_0, window_bounds = array<i64: 16, 128>}, {transform_indices = @transform_1, window_bounds = array<i64: 16, 128>}]} {
    %c16_i32 = arith.constant 16 : i32
    %0 = arith.muli %arg0, %c16_i32 : i32
    %1 = tpu.iota {dimensions = array<i32: 0>} : vector<16x128xi32>
    %2 = tpu.iota {dimensions = array<i32: 1>} : vector<16x128xi32>
    %3 = vector.broadcast %0 : i32 to vector<16x128xi32>
    %4 = arith.addi %3, %1 : vector<16x128xi32>
    %c128_i32 = arith.constant 128 : i32
    %5 = vector.broadcast %c128_i32 : i32 to vector<16x128xi32>
    %6 = arith.muli %4, %5 : vector<16x128xi32>
    %7 = arith.addi %6, %2 : vector<16x128xi32>
    %c0 = arith.constant 0 : index
    %8 = memref.load %arg1[%c0] : memref<1xi32, #tpu.memory_space<smem>>
    %c-1640531527_i32 = arith.constant -1640531527 : i32
    %9 = arith.muli %8, %c-1640531527_i32 : i32
    %10 = vector.broadcast %9 : i32 to vector<16x128xi32>
    %11 = arith.addi %7, %10 : vector<16x128xi32>
    %c16_i32_0 = arith.constant 16 : i32
    %12 = vector.broadcast %c16_i32_0 : i32 to vector<16x128xi32>
    %13 = arith.shrui %11, %12 : vector<16x128xi32>
    %14 = arith.xori %11, %13 : vector<16x128xi32>
    %c2146121005_i32 = arith.constant 2146121005 : i32
    %15 = vector.broadcast %c2146121005_i32 : i32 to vector<16x128xi32>
    %16 = arith.muli %14, %15 : vector<16x128xi32>
    %c15_i32 = arith.constant 15 : i32
    %17 = vector.broadcast %c15_i32 : i32 to vector<16x128xi32>
    %18 = arith.shrui %16, %17 : vector<16x128xi32>
    %19 = arith.xori %16, %18 : vector<16x128xi32>
    %c-2073254261_i32 = arith.constant -2073254261 : i32
    %20 = vector.broadcast %c-2073254261_i32 : i32 to vector<16x128xi32>
    %21 = arith.muli %19, %20 : vector<16x128xi32>
    %c16_i32_1 = arith.constant 16 : i32
    %22 = vector.broadcast %c16_i32_1 : i32 to vector<16x128xi32>
    %23 = arith.shrui %21, %22 : vector<16x128xi32>
    %24 = arith.xori %21, %23 : vector<16x128xi32>
    %c1288490189_i32 = arith.constant 1288490189 : i32
    %25 = vector.broadcast %c1288490189_i32 : i32 to vector<16x128xi32>
    %26 = arith.cmpi uge, %24, %25 : vector<16x128xi32>
    %c0_2 = arith.constant 0 : index
    %c0_3 = arith.constant 0 : index
    %27 = vector.load %arg2[%c0_2, %c0_3] : memref<16x128xf32, #tpu.memory_space<vmem>>, vector<16x128xf32>
    %cst = arith.constant 0.000000e+00 : f32
    %28 = vector.broadcast %cst : f32 to vector<16x128xf32>
    %29 = arith.select %26, %27, %28 : vector<16x128xi1>, vector<16x128xf32>
    %c0_4 = arith.constant 0 : index
    %c0_5 = arith.constant 0 : index
    %30 = vector.load %arg3[%c0_4, %c0_5] : memref<16x128xf32, #tpu.memory_space<vmem>>, vector<16x128xf32>
    tpu.vector_store %arg3[%c0_4, %c0_5], %29 {strides = array<i32>} : memref<16x128xf32, #tpu.memory_space<vmem>>, vector<16x128xf32>,
    return
  }
  func.func @transform_0(%arg0: i32, %arg1: memref<1xi32, #tpu.memory_space<smem>>) -> (i32, i32) {
    %c0_i32 = arith.constant 0 : i32
    %c0_i32_0 = arith.constant 0 : i32
    return %arg0, %c0_i32 : i32, i32
  }
  func.func @transform_1(%arg0: i32, %arg1: memref<1xi32, #tpu.memory_space<smem>>) -> (i32, i32) {
    %c0_i32 = arith.constant 0 : i32
    %c0_i32_0 = arith.constant 0 : i32
    return %arg0, %c0_i32 : i32, i32
  }
}

</mosaic_0001>

<bundles_post_ra>
// kernel: tpu_custom_call.1
= control target key start
LH: loop header
LB: loop body
LE: loop exit
PB: predicated region body
PF: predicated region fallthrough
CT: control target
= control target key end

     0   :  { %8 = vsyncpa [#allocation5], 0  ;;  %s184_s0 = inlined_call_operand.<no memory space> [shape: s32[1], index: 0, kind: input, shape index: {}]   ;;  %s185_s1 = inlined_call_operand.hbm [shape: f32[16,128], index: 1, kind: input, shape index: {}]   ;;  %s186_s2 = inlined_call_operand.hbm [shape: f32[16,128], index: 2, kind: output, shape index: {}]  }
   0x1   :  { %9 = vsyncpa [#allocation6], 0  ;;  %s14_s11 = sshll.u32 %s185_s1, 4  ;;  %s150_s12 = smov [#allocation4]   ;;  %s15_s11 = int_to_ptr.hbm [resolvable:$true] %s14_s11 }
   0x2   :  { %s16_s13 = sshll.u32 %s150_s12, 4  ;;  %s151_s14 = smov 128   ;;  %s17_s13 = int_to_ptr.vmem [resolvable:$true] %s16_s13 }
   0x3   :  { %s152_s15 = smov 8  }
   0x4   :  { %22 = dma.hbm_to_vmem [thread:$0]  %s15_s11, 256, %s17_s13, [#allocation5], %s151_s14, %s151_s14, %s152_s15  }
   0x5   :  { %146 = dma.done.wait [#allocation5], 256  }
   0x6   :  { %147 = vsyncadd [#allocation5], 4294967040  ;;  %v28_v0 = vlaneseq  ;;  %s41_s18 = smul.u32 2654435769, %s184_s0  ;;  %v67_v27 = vld [vmem:[#allocation4] sm:$0xff]  ;;  %s153_s0 = smov [#allocation7]  }
   0x7   :  { %s77_s1 = sshll.u32 %s153_s0, 4  ;;  %s79_s21 = sshll.u32 %s186_s2, 4  ;;  %v68_v30 = vld [vmem:[#allocation4 + $0x8] sm:$0xff]  ;;  %s78_s1 = int_to_ptr.vmem [resolvable:$true] %s77_s1  ;;  %s80_s21 = int_to_ptr.hbm [resolvable:$true] %s79_s21 }
   0x8   :  { %v29_v1 = vshrl.u32 %v28_v0, 7  ;;  %v32_v2 = vand.u32 127, %v28_v0  ;;  %v42_v5 = vstv %s41_s18 }
   0xa   :  { %v36_v3 = vmul.u32 128, %v29_v1  ;;  %v30_v4 = vadd.s32 8, %v29_v1 }
   0xc   :  { %v38_v6 = vadd.s32 %v36_v3, %v32_v2  ;;  %v37_v7 = vmul.u32 128, %v30_v4 }
   0xe   :  { %v43_v8 = vadd.s32 %v42_v5, %v38_v6  ;;  %v39_v9 = vadd.s32 %v37_v7, %v32_v2 }
  0x10   :  { %v45_v10 = vshrl.u32 %v43_v8, 16  ;;  %v44_v11 = vadd.s32 %v42_v5, %v39_v9 }
  0x12   :  { %v47_v12 = vxor.u32 %v45_v10, %v43_v8  ;;  %v46_v13 = vshrl.u32 %v44_v11, 16 }
  0x14   :  { %v49_v14 = vmul.u32 2146121005, %v47_v12  ;;  %v48_v15 = vxor.u32 %v46_v13, %v44_v11 }
  0x16   :  { %v51_v16 = vshrl.u32 %v49_v14, 15  ;;  %v50_v17 = vmul.u32 2146121005, %v48_v15 }
  0x18   :  { %v53_v18 = vxor.u32 %v51_v16, %v49_v14  ;;  %v52_v19 = vshrl.u32 %v50_v17, 15 }
  0x1a   :  { %v55_v20 = vmul.u32 2221713035, %v53_v18  ;;  %v54_v21 = vxor.u32 %v52_v19, %v50_v17 }
  0x1c   :  { %v57_v22 = vshrl.u32 %v55_v20, 16  ;;  %v56_v23 = vmul.u32 2221713035, %v54_v21 }
  0x1e   :  { %v59_v24 = vxor.u32 %v57_v22, %v55_v20  ;;  %v58_v25 = vshrl.u32 %v56_v23, 16 }
  0x20   :  { %v92_v26 = vxor.u32 2147483648, %v59_v24  ;;  %v60_v28 = vxor.u32 %v58_v25, %v56_v23 }
  0x22   :  { %vm63_vm0 = vcmp.ge.s32.totalorder %v92_v26, 3435973837  ;;  %v93_v29 = vxor.u32 2147483648, %v60_v28 }
  0x23   :  { %v69_v31 = vsel %vm63_vm0, %v67_v27, 0.0 }
  0x24   :  { %71 = vst [vmem:[#allocation7] sm:$0xff] %v69_v31  ;;  %vm66_vm1 = vcmp.ge.s32.totalorder %v93_v29, 3435973837 }
  0x25   :  { %v70_v32 = vsel %vm66_vm1, %v68_v30, 0.0 }
  0x26   :  { %72 = vst [vmem:[#allocation7 + $0x8] sm:$0xff] %v70_v32 }
  0x27   :  { %85 = dma.vmem_to_hbm [thread:$0]  %s78_s1, 256, %s80_s21, [#allocation6], %s151_s14, %s151_s14, %s152_s15  }
  0x28   :  { %148 = dma.done.wait [#allocation6], 256  }
  0x29   :  { %149 = vsyncadd [#allocation6], 4294967040 }
  0x2a   :  { %90 = vsyncpa [#allocation5], 1 }
  0x2b   :  { %91 = vsyncpa [#allocation6], 1 }

</bundles_post_ra>
